<compile_context>
chip_gen: v6e
topology: v6e:2x2x1
jax: 0.10.0
libtpu: 0.0.40
codegen_flags: <defaults>
</compile_context>

<pallas_src>
import functools
import math

import jax
import jax.numpy as jnp
from jax.experimental import pallas as pl
from jax.experimental.pallas import tpu as pltpu

_EPS = 1e-5                      # nn.LayerNorm default
_LANES = 128
_SUBLANES = 16                   # multiple of 8 (f32) and 16 (bf16 packing)
_MAX_PACKED_LANES = 512          # accept W = lcm(g, 128) up to this width
_MIN_PALLAS_ELEMS = 1 << 15      # below this, fused XLA beats pallas_call cost


def _cdiv(a, b):
    return -(-a // b)


def _round_up(a, b):
    return _cdiv(a, b) * b


@functools.lru_cache(maxsize=None)
def _tpu_config():
    """Per-generation (num_tensorcores, tile_bytes, vmem_limit_bytes)."""
    kind = ""
    try:
        kind = jax.devices()[0].device_kind.lower()
    except Exception:  # pragma: no cover - defensive (e.g. interpret mode)
        pass
    if "v7" in kind:
        # 2 TensorCores share the grid; 64 MiB physical VMEM per core, and the
        # f32 temporaries blow the live footprint up ~10-14x the tile bytes.
        return {"num_tc": 2, "tile_bytes": 2 << 20, "vmem_limit": 48 << 20}
    # v5e / v6e: single TensorCore, 128 MiB VMEM -> one big tile, larger budget
    # (96 MiB leaves headroom for the f32 temporaries of a 4 MiB bf16 tile).
    return {"num_tc": 1, "tile_bytes": 4 << 20, "vmem_limit": 96 << 20}


def _packed_lane_width(g):
    """Lane width W = lcm(g, 128) for the lane-dense path, or None if too wide."""
    w = g * _LANES // math.gcd(g, _LANES)
    return w if w <= _MAX_PACKED_LANES else None


def _pick_row_tile(rows, row_bytes, num_tc, target_tile_bytes):
    """Row tile: as large as the per-generation budget allows, sublane aligned.

    On multi-TensorCore chips (v7x) the number of grid steps is made a multiple
    of the core count so dimension_semantics=('parallel',) balances the cores.
    On single-TC chips the grid is a serial loop, so no forced splitting.
    """
    rows_al = _round_up(rows, _SUBLANES)
    tr = max(_SUBLANES, (target_tile_bytes // row_bytes) // _SUBLANES * _SUBLANES)
    tr = min(tr, rows_al)
    if num_tc > 1 and rows_al > num_tc * _SUBLANES:
        steps_per_core = max(1, _cdiv(rows_al, num_tc * tr))
        tr = _round_up(_cdiv(rows_al, num_tc * steps_per_core), _SUBLANES)
    return tr


# ---------------------------------------------------------------------------
# Kernels
# ---------------------------------------------------------------------------

def _packed_kernel(a_ref, x_ref, o_ref):
    """x_ref/o_ref: (tr, W) lane-dense tile; each W-lane row holds W//g groups.

    a_ref: (W, W) block-diagonal matrix of 1/g blocks, so x @ a reduces each
    group and broadcasts its mean back to the group's lanes in one MXU op.
    Ragged last blocks contain undefined rows: they never mix across rows here
    and are masked on store (NaN/Inf in those rows is harmless).
    """
    x = x_ref[...]
    a = a_ref[...]
    if x.dtype == jnp.float32:
        # f32 path: Mosaic's default f32 matmul already meets the 1e-5
        # tolerance vs the f32 reference (verified on-device); we deliberately
        # do not force Precision.HIGHEST (extra MXU passes, no accuracy need).
        mean = jnp.dot(x, a, preferred_element_type=jnp.float32)        # MXU
        c = x - mean                                                    # VPU
        var = jnp.dot(c * c, a, preferred_element_type=jnp.float32)     # MXU
        inv = jax.lax.rsqrt(var + _EPS)                                 # EUP
        o_ref[...] = (c * inv).astype(o_ref.dtype)
    else:
        # bf16 path: native-dtype MXU operands (single pass -> v5e stays on the
        # HBM roofline) and a bf16 VPU elementwise chain (v7x vector-ALU slot),
        # with f32 accumulation on the MXU for the statistics.
        mean = jnp.dot(x, a, preferred_element_type=jnp.float32)        # MXU
        c = x - mean.astype(x.dtype)                                    # bf16 VPU
        var = jnp.dot(c * c, a, preferred_element_type=jnp.float32)     # MXU
        inv = jax.lax.rsqrt(var + _EPS).astype(x.dtype)                 # EUP
        o_ref[...] = (c * inv).astype(o_ref.dtype)                      # bf16 VPU


def _rowwise_kernel(x_ref, o_ref):
    """Fallback for g where lcm(g, 128) > 512: (tr, g) tiles, per-row LayerNorm."""
    x = x_ref[...].astype(jnp.float32)
    mean = jnp.mean(x, axis=-1, keepdims=True)
    c = x - mean
    var = jnp.mean(c * c, axis=-1, keepdims=True)
    inv = jax.lax.rsqrt(var + _EPS)
    o_ref[...] = (c * inv).astype(o_ref.dtype)


# ---------------------------------------------------------------------------
# pallas_call wrappers
# ---------------------------------------------------------------------------

def _block_layer_norm_packed(x_flat, n, g, w, out_dtype, tile_bytes):
    """x_flat: (n,) contiguous; every consecutive g elements form one group."""
    cfg = _tpu_config()
    rows = _cdiv(n, w)
    tr = _pick_row_tile(rows, w * x_flat.dtype.itemsize, cfg["num_tc"],
                        tile_bytes or cfg["tile_bytes"])

    pad = rows * w - n
    if pad:
        # Only the ragged flat tail (< W elements) is padded; padded groups are
        # all-zero -> var=0 -> finite output, sliced off below.  When n % W == 0
        # (the common case) there is no pad and no trailing slice at all.
        x_flat = jnp.pad(x_flat, (0, pad))
    x2 = x_flat.reshape(rows, w)

    lane = jnp.arange(w, dtype=jnp.int32)
    a_mat = jnp.where((lane[:, None] // g) == (lane[None, :] // g),
                      1.0 / g, 0.0).astype(x2.dtype)

    out = pl.pallas_call(
        _packed_kernel,
        out_shape=jax.ShapeDtypeStruct((rows, w), out_dtype),
        grid_spec=pltpu.PrefetchScalarGridSpec(
            num_scalar_prefetch=0,
            grid=(pl.cdiv(rows, tr),),           # ragged last block is masked
            in_specs=[
                pl.BlockSpec((w, w), lambda i: (0, 0)),   # A: constant block -> resident
                pl.BlockSpec((tr, w), lambda i: (i, 0)),
            ],
            out_specs=pl.BlockSpec((tr, w), lambda i: (i, 0)),
        ),
        compiler_params=pltpu.CompilerParams(
            dimension_semantics=("parallel",),
            vmem_limit_bytes=cfg["vmem_limit"],
        ),
    )(a_mat, x2)

    y = out.reshape(-1)
    if pad:
        y = y[:n]
    return y


def _block_layer_norm_rowwise(x_rows, out_dtype, tile_bytes):
    """x_rows: (R, g); each row normalized over its full last axis (any g)."""
    cfg = _tpu_config()
    r, g = x_rows.shape
    tr = _pick_row_tile(r, g * x_rows.dtype.itemsize, cfg["num_tc"],
                        tile_bytes or cfg["tile_bytes"])
    return pl.pallas_call(
        _rowwise_kernel,
        out_shape=jax.ShapeDtypeStruct((r, g), out_dtype),
        grid_spec=pltpu.PrefetchScalarGridSpec(
            num_scalar_prefetch=0,
            grid=(pl.cdiv(r, tr),),              # ragged last block is masked
            in_specs=[pl.BlockSpec((tr, g), lambda i: (i, 0))],
            out_specs=pl.BlockSpec((tr, g), lambda i: (i, 0)),
        ),
        compiler_params=pltpu.CompilerParams(
            dimension_semantics=("parallel",),
            vmem_limit_bytes=cfg["vmem_limit"],
        ),
    )(x_rows)


def _reference(x, k):
    *_, d = x.shape
    g = d // k
    xr = x.reshape(-1, k, g).astype(jnp.float32)
    mean = jnp.mean(xr, axis=-1, keepdims=True)
    var = jnp.mean((xr - mean) ** 2, axis=-1, keepdims=True)
    y = (xr - mean) * jax.lax.rsqrt(var + _EPS)
    return y.reshape(x.shape).astype(x.dtype)


@functools.partial(jax.jit, static_argnames=("k", "min_pallas_elems", "tile_bytes"))
def block_layer_norm(x, k, *, min_pallas_elems=_MIN_PALLAS_ELEMS, tile_bytes=None):
    """BlockLayerNorm forward. x: (..., D) with D % k == 0; g = D // k."""
    *_, d = x.shape
    assert d % k == 0
    g = d // k
    n = x.size

    if n < min_pallas_elems:
        # Tiny input: pallas_call fixed overhead dominates; let XLA fuse it.
        return _reference(x, k)

    w = _packed_lane_width(g)
    if w is not None:
        y_flat = _block_layer_norm_packed(x.reshape(-1), n, g, w, x.dtype, tile_bytes)
        return y_flat.reshape(x.shape)

    # lcm(g, 128) too wide to pack: row-wise fallback (rare / unusual g).
    r = (n // d) * k
    y = _block_layer_norm_rowwise(x.reshape(r, g), x.dtype, tile_bytes)
    return y.reshape(x.shape)


# ---------------------------------------------------------------------------
# Demo / correctness checks
# ---------------------------------------------------------------------------

if __name__ == "__main__":
    key = jax.random.PRNGKey(0)
    k0, k1, k2, k3 = jax.random.split(key, 4)

    # Module config: size=32, k=4 -> g=8.  Input: (batch=2, seq=8, size=32).
    size, k = 32, 4
    x = jax.random.normal(k0, (2, 8, size), dtype=jnp.float32)
    y = block_layer_norm(x, k, min_pallas_elems=0)   # force the Pallas path
    jax.block_until_ready(y)
    assert y.shape == x.shape
    assert jnp.allclose(y, _reference(x, k), atol=1e-5, rtol=1e-5), "f32 mismatch"

    # bf16, lane packing (g=8 -> W=128): bf16 MXU operands + bf16 VPU chain.
    xb = jax.random.normal(k1, (4, 64, 128), dtype=jnp.bfloat16)
    yb = block_layer_norm(xb, 16, min_pallas_elems=0)
    jax.block_until_ready(yb)
    assert jnp.allclose(yb.astype(jnp.float32),
                        _reference(xb, 16).astype(jnp.float32),
                        atol=3e-2, rtol=3e-2), "bf16 mismatch"

    # g=48 does not divide 128 -> lane-dense W = lcm(48, 128) = 384 packed path.
    xo = jax.random.normal(k2, (2, 4, 96), dtype=jnp.float32)
    yo = block_layer_norm(xo, 2, min_pallas_elems=0)
    jax.block_until_ready(yo)
    assert jnp.allclose(yo, _reference(xo, 2), atol=1e-5, rtol=1e-5), "lcm-path mismatch"

    # Ragged multi-step grid + flat-tail pad: tiny tile override forces 2 grid
    # steps with a masked partial last block, and n % 128 != 0.
    xr = jax.random.normal(k3, (2, 41, 32), dtype=jnp.float32)
    yr = block_layer_norm(xr, 4, min_pallas_elems=0, tile_bytes=_SUBLANES * _LANES * 4)
    jax.block_until_ready(yr)
    assert jnp.allclose(yr, _reference(xr, 4), atol=1e-5, rtol=1e-5), "ragged-path mismatch"

    # Tiny-input heuristic path (pure-JAX dispatch) also matches.
    yt = block_layer_norm(x, k)
    jax.block_until_ready(yt)
    assert jnp.allclose(yt, _reference(x, k), atol=1e-5, rtol=1e-5), "tiny-path mismatch"

    print("KERNEL_OK")
</pallas_src>

<mosaic_0001>
module attributes {stable_mosaic.version = 11 : i64} {
  func.func @_packed_kernel(%arg0: i32, %arg1: memref<128x128xf32, #tpu.memory_space<vmem>>, %arg2: memref<16x128xf32, #tpu.memory_space<vmem>>, %arg3: memref<16x128xf32, #tpu.memory_space<vmem>>) attributes {dimension_semantics = [#tpu.dimension_semantics<parallel>], iteration_bounds = array<i64: 1>, scalar_prefetch = 0 : i64, scratch_operands = 0 : i64, tpu.core_type = #tpu.core_type<tc>, window_params = [{pipeline_mode = #tpu.pipeline_mode<synchronous>, transform_indices = @transform_0, window_bounds = array<i64: 128, 128>}, {transform_indices = @transform_1, window_bounds = array<i64: 16, 128>}, {transform_indices = @transform_2, window_bounds = array<i64: 16, 128>}]} {
    %c0 = arith.constant 0 : index
    %c0_0 = arith.constant 0 : index
    %0 = vector.load %arg2[%c0, %c0_0] : memref<16x128xf32, #tpu.memory_space<vmem>>, vector<16x128xf32>
    %c0_1 = arith.constant 0 : index
    %c0_2 = arith.constant 0 : index
    %1 = vector.load %arg1[%c0_1, %c0_2] : memref<128x128xf32, #tpu.memory_space<vmem>>, vector<128x128xf32>
    %cst = arith.constant dense<0.000000e+00> : vector<16x128xf32>
    %2 = tpu.matmul %0, %1, %cst {dimension_numbers = #tpu.dot_dimension_numbers<[1], [0], [0], [1], [0, 0, 1, 1], [], []>} : vector<16x128xf32>, vector<128x128xf32>, vector<16x128xf32> -> vector<16x128xf32>
    %3 = arith.subf %0, %2 : vector<16x128xf32>
    %4 = arith.mulf %3, %3 : vector<16x128xf32>
    %cst_3 = arith.constant dense<0.000000e+00> : vector<16x128xf32>
    %5 = tpu.matmul %4, %1, %cst_3 {dimension_numbers = #tpu.dot_dimension_numbers<[1], [0], [0], [1], [0, 0, 1, 1], [], []>} : vector<16x128xf32>, vector<128x128xf32>, vector<16x128xf32> -> vector<16x128xf32>
    %cst_4 = arith.constant 9.99999974E-6 : f32
    %6 = vector.broadcast %cst_4 : f32 to vector<16x128xf32>
    %7 = arith.addf %5, %6 : vector<16x128xf32>
    %8 = math.rsqrt %7 : vector<16x128xf32>
    %9 = arith.mulf %3, %8 : vector<16x128xf32>
    %c0_5 = arith.constant 0 : index
    %c0_6 = arith.constant 0 : index
    %10 = vector.load %arg3[%c0_5, %c0_6] : memref<16x128xf32, #tpu.memory_space<vmem>>, vector<16x128xf32>
    tpu.vector_store %arg3[%c0_5, %c0_6], %9 {strides = array<i32>} : memref<16x128xf32, #tpu.memory_space<vmem>>, vector<16x128xf32>,
    return
  }
  func.func @transform_0(%arg0: i32) -> (i32, i32) {
    %c0_i32 = arith.constant 0 : i32
    %c0_i32_0 = arith.constant 0 : i32
    %c0_i32_1 = arith.constant 0 : i32
    return %c0_i32, %c0_i32_0 : i32, i32
  }
  func.func @transform_1(%arg0: i32) -> (i32, i32) {
    %c0_i32 = arith.constant 0 : i32
    %c0_i32_0 = arith.constant 0 : i32
    return %arg0, %c0_i32 : i32, i32
  }
  func.func @transform_2(%arg0: i32) -> (i32, i32) {
    %c0_i32 = arith.constant 0 : i32
    %c0_i32_0 = arith.constant 0 : i32
    return %arg0, %c0_i32 : i32, i32
  }
}

</mosaic_0001>

<bundles_post_ra>
// kernel: block_layer_norm.1
= control target key start
LH: loop header
LB: loop body
LE: loop exit
PB: predicated region body
PF: predicated region fallthrough
CT: control target
= control target key end

     0   :  { %s416_s0 = inlined_call_operand.vmem [shape: f32[128,128], index: 0, kind: input, shape index: {}]   ;;  %s417_s1 = inlined_call_operand.vmem [shape: f32[4,128], index: 1, kind: input, shape index: {}]   ;;  %s418_s2 = inlined_call_operand.vmem [shape: f32[4,128], index: 2, kind: output, shape index: {}]  }
   0x1   :  { %v28_v0 = vld [vmem:[%s416_s0 + $0x78] sm:$0xff]  ;;  %v27_v1 = vld [vmem:[%s416_s0 + $0x70] sm:$0xff]  ;;  %v26_v2 = vld [vmem:[%s416_s0 + $0x68] sm:$0xff] }
   0x2   :  { %266 = vmatprep.subr.mxu0 %v28_v0  ;;  %301 = vmatprep.subr.mxu1 %v28_v0  ;;  %v25_v3 = vld [vmem:[%s416_s0 + $0x60] sm:$0xff]  ;;  %v24_v5 = vld [vmem:[%s416_s0 + $0x58] sm:$0xff]  ;;  %v23_v6 = vld [vmem:[%s416_s0 + $0x50] sm:$0xff] }
   0x3   :  { %267 = vmatpush3.msra.mxu0 %v28_v0  ;;  %302 = vmatpush3.msra.mxu1 %v28_v0  ;;  %v370_v4 = vld [vmem:[%s417_s1] sm:$0xff]  ;;  %v22_v7 = vld [vmem:[%s416_s0 + $0x48] sm:$0xff]  ;;  %v20_v9 = vld [vmem:[%s416_s0 + $0x38] sm:$0xff] }
   0x4   :  { %268 = vmatprep.subr.mxu0 %v27_v1  ;;  %303 = vmatprep.subr.mxu1 %v27_v1  ;;  %v21_v8 = vld [vmem:[%s416_s0 + $0x40] sm:$0xff]  ;;  %v19_v10 = vld [vmem:[%s416_s0 + $0x30] sm:$0xff]  ;;  %v18_v11 = vld [vmem:[%s416_s0 + $0x28] sm:$0xff] }
   0x5   :  { %269 = vmatpush3.msra.mxu0 %v27_v1  ;;  %304 = vmatpush3.msra.mxu1 %v27_v1  ;;  %v17_v12 = vld [vmem:[%s416_s0 + $0x20] sm:$0xff]  ;;  %v16_v13 = vld [vmem:[%s416_s0 + $0x18] sm:$0xff]  ;;  %v15_v14 = vld [vmem:[%s416_s0 + $0x10] sm:$0xff] }
   0x6   :  { %270 = vmatprep.subr.mxu0 %v26_v2  ;;  %305 = vmatprep.subr.mxu1 %v26_v2  ;;  %v14_v15 = vld [vmem:[%s416_s0 + $0x8] sm:$0xff]  ;;  %v13_v16 = vld [vmem:[%s416_s0] sm:$0xff] }
   0x7   :  { %271 = vmatpush3.msra.mxu0 %v26_v2  ;;  %298 = vmatprep.mubr.f32.mxu0 %v370_v4  ;;  %v12_v17 = vld [vmem:[%s417_s1 + $0x8] sm:$0xff] }
   0x8   :  { %272 = vmatprep.subr.mxu0 %v25_v3  ;;  %306 = vmatpush3.msra.mxu1 %v26_v2 }
   0x9   :  { %273 = vmatpush3.msra.mxu0 %v25_v3  ;;  %307 = vmatprep.subr.mxu1 %v25_v3 }
   0xa   :  { %274 = vmatprep.subr.mxu0 %v24_v5  ;;  %308 = vmatpush3.msra.mxu1 %v25_v3 }
   0xb   :  { %275 = vmatpush3.msra.mxu0 %v24_v5  ;;  %309 = vmatprep.subr.mxu1 %v24_v5 }
   0xc   :  { %276 = vmatprep.subr.mxu0 %v23_v6  ;;  %310 = vmatpush3.msra.mxu1 %v24_v5 }
   0xd   :  { %277 = vmatpush3.msra.mxu0 %v23_v6  ;;  %311 = vmatprep.subr.mxu1 %v23_v6 }
   0xe   :  { %278 = vmatprep.subr.mxu0 %v22_v7  ;;  %312 = vmatpush3.msra.mxu1 %v23_v6 }
   0xf   :  { %279 = vmatpush3.msra.mxu0 %v22_v7  ;;  %313 = vmatprep.subr.mxu1 %v22_v7 }
  0x10   :  { %280 = vmatprep.subr.mxu0 %v21_v8  ;;  %314 = vmatpush3.msra.mxu1 %v22_v7 }
  0x11   :  { %281 = vmatpush3.msra.mxu0 %v21_v8  ;;  %315 = vmatprep.subr.mxu1 %v21_v8 }
  0x12   :  { %282 = vmatprep.subr.mxu0 %v20_v9  ;;  %316 = vmatpush3.msra.mxu1 %v21_v8 }
  0x13   :  { %283 = vmatpush3.msra.mxu0 %v20_v9  ;;  %317 = vmatprep.subr.mxu1 %v20_v9 }
  0x14   :  { %284 = vmatprep.subr.mxu0 %v19_v10  ;;  %318 = vmatpush3.msra.mxu1 %v20_v9 }
  0x15   :  { %285 = vmatpush3.msra.mxu0 %v19_v10  ;;  %319 = vmatprep.subr.mxu1 %v19_v10 }
  0x16   :  { %286 = vmatprep.subr.mxu0 %v18_v11  ;;  %320 = vmatpush3.msra.mxu1 %v19_v10 }
  0x17   :  { %287 = vmatpush3.msra.mxu0 %v18_v11  ;;  %321 = vmatprep.subr.mxu1 %v18_v11 }
  0x18   :  { %288 = vmatprep.subr.mxu0 %v17_v12  ;;  %322 = vmatpush3.msra.mxu1 %v18_v11 }
  0x19   :  { %289 = vmatpush3.msra.mxu0 %v17_v12  ;;  %323 = vmatprep.subr.mxu1 %v17_v12 }
  0x1a   :  { %290 = vmatprep.subr.mxu0 %v16_v13  ;;  %324 = vmatpush3.msra.mxu1 %v17_v12 }
  0x1b   :  { %291 = vmatpush3.msra.mxu0 %v16_v13  ;;  %325 = vmatprep.subr.mxu1 %v16_v13 }
  0x1c   :  { %292 = vmatprep.subr.mxu0 %v15_v14  ;;  %326 = vmatpush3.msra.mxu1 %v16_v13 }
  0x1d   :  { %293 = vmatpush3.msra.mxu0 %v15_v14  ;;  %327 = vmatprep.subr.mxu1 %v15_v14 }
  0x1e   :  { %294 = vmatprep.subr.mxu0 %v14_v15  ;;  %328 = vmatpush3.msra.mxu1 %v15_v14 }
  0x1f   :  { %295 = vmatpush3.msra.mxu0 %v14_v15  ;;  %329 = vmatprep.subr.mxu1 %v14_v15 }
  0x20   :  { %296 = vmatprep.subr.mxu0 %v13_v16  ;;  %330 = vmatpush3.msra.mxu1 %v14_v15 }
  0x21   :  { %297 = vmatpush3.msra.mxu0 %v13_v16  ;;  %331 = vmatprep.subr.mxu1 %v13_v16 }
  0x22   :  { %299 = vmatmul.mubr.f32.vlgmr.msra.gmra.mxu0 %v12_v17  ;;  %332 = vmatpush3.msra.mxu1 %v13_v16 }
  0xe2   :  { %v300_v18 = vpop.f32.mrf.mxu0 }
  0xe3   :  { %v105_v19 = vsub.f32 %v12_v17, %v300_v18 }
  0xe4   :  { %v95_v20 = vpop.f32.mrf.mxu0 }
  0xe5   :  { %v104_v21 = vsub.f32 %v370_v4, %v95_v20  ;;  %v107_v23 = vmul.f32 %v105_v19, %v105_v19 }
  0xe7   :  { %v106_v22 = vmul.f32 %v104_v21, %v104_v21 }
  0xe9   :  { %333 = vmatprep.mubr.f32.mxu1 %v106_v22 }
  0xea   :  { %334 = vmatmul.mubr.f32.vlgmr.msra.gmra.mxu1 %v107_v23 }
 0x1aa   :  { %v335_v24 = vpop.f32.mrf.mxu1 }
 0x1ab   :  { %v180_v25 = vadd.f32 1e-05, %v335_v24 }
 0x1ac   :  { %v174_v26 = vpop.f32.mrf.mxu1 }
 0x1ad   :  { %336 = vrsqrt.f32 %v180_v25  ;;  %v175_v27 = vadd.f32 1e-05, %v174_v26 }
 0x1af   :  { %338 = vrsqrt.f32 %v175_v27 }
 0x1ba   :  { %v337_v28 = vpop.eup %336 }
 0x1bc   :  { %v339_v29 = vpop.eup %338 }
 0x1bd   :  { %v185_v30 = vmul.f32 %v339_v29, %v104_v21 }
 0x1bf   :  { %187 = vst [vmem:[#allocation2] sm:$0xff] %v185_v30 }
 0x1c6   :  { %v207_v31 = vld [vmem:[#allocation2] sm:$0xf] }
 0x1c7   :  { %208 = vst [vmem:[%s418_s2] sm:$0xf] %v207_v31 }

</bundles_post_ra>
